<compile_context>
chip_gen: v6e
topology: v6e:2x2x1
jax: 0.10.0
libtpu: 0.0.40
codegen_flags: <defaults>
</compile_context>

<pallas_src>
import jax
import jax.numpy as jnp
from jax import lax
from jax.experimental import pallas as pl
from jax.experimental.pallas import tpu as pltpu


def _exist_kernel(x_ref, w_ref, o_ref):
    # x_ref: (TB, F)   w_ref: (2, F) lane-dense   o_ref: (TB, 2)
    y = lax.dot_general(
        x_ref[...], w_ref[...],
        dimension_numbers=(((1,), (1,)), ((), ())),   # contract on F
        preferred_element_type=jnp.float32,
    )
    o_ref[...] = y.astype(o_ref.dtype)


def _choose_batch_tile(batch, feat, dtype_bytes=4):
    """Pick TB so 2 (double-buffer) * TB * F * bytes stays ~<= 8 MiB."""
    budget = 8 * 1024 * 1024
    bytes_per_row = max(1, feat * dtype_bytes)
    tb = min(1024, budget // (2 * bytes_per_row))
    tb = max(8, (tb // 8) * 8)          # multiple of 8 (sublane)
    if batch <= tb:
        return batch                    # single block == full dim (always legal)
    return tb


def exist_forward(attention, weight, bias):
    """attention: (B, C, H, W) f32; weight: (2, F) [torch layout]; bias: (2,)."""
    batch = attention.shape[0]
    x = attention.reshape(batch, -1)    # glue: same as torch.reshape (contiguous NCHW)
    feat = x.shape[1]
    assert weight.shape == (2, feat)
    assert bias.shape == (2,)

    tb = _choose_batch_tile(batch, feat)
    grid = (pl.cdiv(batch, tb),)

    out = pl.pallas_call(
        _exist_kernel,
        out_shape=jax.ShapeDtypeStruct((batch, 2), jnp.float32),
        grid=grid,
        in_specs=[
            pl.BlockSpec((tb, feat), lambda i: (i, 0)),   # x: batch-tiled, pipelined
            pl.BlockSpec((2, feat), lambda i: (0, 0)),    # weight: resident, lane-dense
        ],
        out_specs=pl.BlockSpec((tb, 2), lambda i: (i, 0)),
        compiler_params=pltpu.CompilerParams(
            dimension_semantics=("parallel",)),           # v7x: shard tiles over 2 TCs
    )(x, weight)

    # Bias add in the wrapper (fused by XLA); avoids a padded VMEM tile + DMA
    # stream inside the kernel for 8 bytes of data.
    return out + bias[None, :]


if __name__ == "__main__":
    # input_dim = (1, 16, 16)  ->  fc1: Linear(16*16 = 256, 2)
    H = W = 16
    B, C = 2, 1
    feat = H * W

    key = jax.random.PRNGKey(0)
    k_x, k_w, k_b = jax.random.split(key, 3)

    attention = jax.random.normal(k_x, (B, C, H, W), dtype=jnp.float32)
    # Deterministic synthetic Linear params in native torch layout (out, in).
    bound = 1.0 / (feat ** 0.5)
    weight = jax.random.uniform(k_w, (2, feat), jnp.float32, -bound, bound)
    bias = jax.random.uniform(k_b, (2,), jnp.float32, -bound, bound)

    out = exist_forward(attention, weight, bias)
    out = jax.block_until_ready(out)

    # Sanity check against pure-JAX reference (y = x @ W.T + b, torch layout).
    ref = attention.reshape(B, -1) @ weight.T + bias
    assert out.shape == (B, 2)
    assert jnp.allclose(out, ref, atol=1e-5, rtol=1e-5)

    print("KERNEL_OK")
</pallas_src>

<mosaic_0001>
module attributes {stable_mosaic.version = 11 : i64} {
  func.func @_exist_kernel(%arg0: i32, %arg1: memref<2x256xf32, #tpu.memory_space<vmem>>, %arg2: memref<2x256xf32, #tpu.memory_space<vmem>>, %arg3: memref<2x2xf32, #tpu.memory_space<vmem>>) attributes {dimension_semantics = [#tpu.dimension_semantics<parallel>], iteration_bounds = array<i64: 1>, scalar_prefetch = 0 : i64, scratch_operands = 0 : i64, tpu.core_type = #tpu.core_type<tc>, window_params = [{transform_indices = @transform_0, window_bounds = array<i64: 2, 256>}, {pipeline_mode = #tpu.pipeline_mode<synchronous>, transform_indices = @transform_1, window_bounds = array<i64: 2, 256>}, {transform_indices = @transform_2, window_bounds = array<i64: 2, 2>}]} {
    %c0 = arith.constant 0 : index
    %c0_0 = arith.constant 0 : index
    %0 = vector.load %arg1[%c0, %c0_0] : memref<2x256xf32, #tpu.memory_space<vmem>>, vector<2x256xf32>
    %c0_1 = arith.constant 0 : index
    %c0_2 = arith.constant 0 : index
    %1 = vector.load %arg2[%c0_1, %c0_2] : memref<2x256xf32, #tpu.memory_space<vmem>>, vector<2x256xf32>
    %cst = arith.constant dense<0.000000e+00> : vector<2x2xf32>
    %2 = tpu.matmul %0, %1, %cst {dimension_numbers = #tpu.dot_dimension_numbers<[1], [1], [0], [0], [0, 0, 1, 0], [], []>} : vector<2x256xf32>, vector<2x256xf32>, vector<2x2xf32> -> vector<2x2xf32>
    %c0_3 = arith.constant 0 : index
    %c0_4 = arith.constant 0 : index
    %3 = vector.load %arg3[%c0_3, %c0_4] : memref<2x2xf32, #tpu.memory_space<vmem>>, vector<2x2xf32>
    tpu.vector_store %arg3[%c0_3, %c0_4], %2 {strides = array<i32>} : memref<2x2xf32, #tpu.memory_space<vmem>>, vector<2x2xf32>,
    return
  }
  func.func @transform_0(%arg0: i32) -> (i32, i32) {
    %c0_i32 = arith.constant 0 : i32
    %c0_i32_0 = arith.constant 0 : i32
    return %arg0, %c0_i32 : i32, i32
  }
  func.func @transform_1(%arg0: i32) -> (i32, i32) {
    %c0_i32 = arith.constant 0 : i32
    %c0_i32_0 = arith.constant 0 : i32
    %c0_i32_1 = arith.constant 0 : i32
    return %c0_i32, %c0_i32_0 : i32, i32
  }
  func.func @transform_2(%arg0: i32) -> (i32, i32) {
    %c0_i32 = arith.constant 0 : i32
    %c0_i32_0 = arith.constant 0 : i32
    return %arg0, %c0_i32 : i32, i32
  }
}

</mosaic_0001>

<bundles_post_ra>
// kernel: tpu_custom_call.1
= control target key start
LH: loop header
LB: loop body
LE: loop exit
PB: predicated region body
PF: predicated region fallthrough
CT: control target
= control target key end

     0   :  { %7 = vsyncpa [#allocation3], 0  ;;  %s246_s0 = inlined_call_operand.hbm [shape: f32[2,256], index: 0, kind: input, shape index: {}]   ;;  %s247_s1 = inlined_call_operand.hbm [shape: f32[2,256], index: 1, kind: input, shape index: {}]   ;;  %s248_s2 = inlined_call_operand.hbm [shape: f32[2,2], index: 2, kind: output, shape index: {}]  }
   0x1   :  { %8 = vsyncpa [#allocation6], 0 }
   0x2   :  { %9 = vsyncpa [#allocation4], 0  ;;  %s219_s9 = smov [#allocation2]   ;;  %s220_s11 = smov [#allocation5]  }
   0x3   :  { %s16_s10 = sshll.u32 %s219_s9, 4  ;;  %s26_s12 = sshll.u32 %s220_s11, 4  ;;  %s17_s10 = int_to_ptr.vmem [resolvable:$true] %s16_s10  ;;  %s27_s12 = int_to_ptr.vmem [resolvable:$true] %s26_s12 }
   0x4   :  { %s161_s13 = scalar_lea.vmem %s17_s10, 64  ;;  %p166_p1 = scmp.lt.s32.totalorder %s17_s10, %s17_s10 }
   0x5   :  { %p162_p0 = scmp.ne.s32.totalorder %s17_s10, %s161_s13  ;;  %p167_p2 = scmp.lt.s32.totalorder %s161_s13, %s161_s13 }
   0x7   :  { %p168_p3 = por %p167_p2, %p166_p1 }
   0x9   :  { %p169_p4 = pnand %p168_p3, %p162_p0 }
   0xb   :  { %172 = shalt.err (!%p169_p4)
}
   0xc   :  { %19 = dma.hbm_to_vmem [thread:$0]  %s246_s0, 64, %s17_s10, [#allocation3]  }
   0xd   :  { %s181_s16 = scalar_lea.vmem %s27_s12, 64  ;;  %p186_p6 = scmp.lt.s32.totalorder %s27_s12, %s27_s12 }
   0xe   :  { %p182_p5 = scmp.ne.s32.totalorder %s27_s12, %s181_s16  ;;  %p187_p7 = scmp.lt.s32.totalorder %s181_s16, %s181_s16 }
  0x10   :  { %p188_p8 = por %p187_p7, %p186_p6 }
  0x12   :  { %p189_p9 = pnand %p188_p8, %p182_p5 }
  0x14   :  { %192 = shalt.err (!%p189_p9)
}
  0x15   :  { %29 = dma.hbm_to_vmem [thread:$0]  %s247_s1, 64, %s27_s12, [#allocation6]  }
  0x16   :  { %213 = dma.done.wait [#allocation3], 64  }
  0x17   :  { %214 = vsyncadd [#allocation3], 4294967232 }
  0x18   :  { %215 = dma.done.wait [#allocation6], 64  }
  0x19   :  { %216 = vsyncadd [#allocation6], 4294967232  ;;  %v149_v0 = vld.sshfl [vmem:[#allocation5] sm:$0x33 pattern:$0x76325410] }
  0x1a   :  { %v57_v1 = vcombine.high %v149_v0, %v149_v0  ;;  %v148_v2 = vld.sshfl [vmem:[#allocation2] sm:$0x33 pattern:$0x76325410]  ;;  %s221_s0 = smov [#allocation7]   ;;  %vm130_vm0 = vcmask 9216  }
  0x1b   :  { %v46_v3 = vcombine.high %v148_v2, %v148_v2  ;;  %s138_s19 = sshll.u32 %s221_s0, 4  ;;  %s139_s19 = int_to_ptr.vmem [resolvable:$true] %s138_s19 }
  0x1c   :  { %90 = vmatprep.subr.mxu0 %v57_v1  ;;  %s193_s1 = scalar_lea.vmem %s139_s19, 32  ;;  %p198_p11 = scmp.lt.s32.totalorder %s139_s19, %s139_s19 }
  0x1d   :  { %91 = vmatpush1.xpose.msra.mxu0 %v149_v0  ;;  %124 = vmatprep.mubr.f32.mxu0 %v46_v3  ;;  %p194_p10 = scmp.ne.s32.totalorder %s139_s19, %s193_s1  ;;  %p199_p12 = scmp.lt.s32.totalorder %s193_s1, %s193_s1 }
  0x1f   :  { %p200_p13 = por %p199_p12, %p198_p11 }
  0x20   :  { %125 = vmatmul.mubr.f32.vlgmr.msra.gmra.mxu0 %v148_v2 }
  0x21   :  { %p201_p0 = pnand %p200_p13, %p194_p10 }
  0xe0   :  { %v126_v4 = vpop.f32.mrf.mxu0 }
  0xe1   :  { %131 = vst.msk [vmem:[#allocation7] sm:$0x3] %vm130_vm0, %v126_v4 }
  0xe2   :  { %v128_v5 = vpop.f32.mrf.mxu0 }
  0xe3   :  { %204 = shalt.err (!%p201_p0)
}
  0xe4   :  { %141 = dma.vmem_to_hbm [thread:$0]  %s139_s19, 32, %s248_s2, [#allocation4]  }
  0xe5   :  { %217 = dma.done.wait [#allocation4], 32  }
  0xe6   :  { %218 = vsyncadd [#allocation4], 4294967264 }
  0xe7   :  { %145 = vsyncpa [#allocation3], 1 }
  0xe8   :  { %146 = vsyncpa [#allocation6], 1 }
  0xe9   :  { %147 = vsyncpa [#allocation4], 1 }

</bundles_post_ra>
